<compile_context>
chip_gen: v5e
topology: v5e:2x2
jax: 0.10.0
libtpu: 0.0.40
codegen_flags: <defaults>
</compile_context>

<pallas_src>
import jax
import jax.numpy as jnp
from jax.experimental import pallas as pl
from jax.experimental.pallas import tpu as pltpu

LANES = 128          # vreg lane width (same on v5e/v6e/v7x)
NEG_SLOPE = 0.01     # torch.nn.LeakyReLU default negative_slope


def _ceil_to(n, m):
    return ((n + m - 1) // m) * m


def _leaky(x):
    return jnp.where(x >= 0, x, NEG_SLOPE * x)


def distnet_kernel(w1_ref, b1_ref, w2_ref, b2_ref, w3_ref, b3_ref,
                   x_ref, o_ref):
    # x_ref: [3, rt, 128] VMEM block (three per-feature batch slabs).
    # w*/b* : SMEM-resident parameters, read as scalars.
    x0 = x_ref[0]
    x1 = x_ref[1]
    x2 = x_ref[2]

    # ---- Linear(3 -> 5) + LeakyReLU : unrolled scalar-broadcast FMAs (VPU)
    h1 = []
    for j in range(5):
        acc = x0 * w1_ref[0, j]
        acc = acc + x1 * w1_ref[1, j]
        acc = acc + x2 * w1_ref[2, j]
        acc = acc + b1_ref[j]
        h1.append(_leaky(acc))

    # ---- Linear(5 -> 5) + LeakyReLU
    h2 = []
    for j in range(5):
        acc = h1[0] * w2_ref[0, j]
        for k in range(1, 5):
            acc = acc + h1[k] * w2_ref[k, j]
        acc = acc + b2_ref[j]
        h2.append(_leaky(acc))

    # ---- Linear(5 -> 1) + Sigmoid  (exp and reciprocal both on the EUP)
    acc = h2[0] * w3_ref[0, 0]
    for k in range(1, 5):
        acc = acc + h2[k] * w3_ref[k, 0]
    acc = acc + b3_ref[0]
    o_ref[...] = pl.reciprocal(1.0 + jnp.exp(-acc), approx=True)


def distnet_forward(x, params, *, max_rows_per_tile=256):
    """x: any shape reshapeable to [-1, 3]; returns [batch, 1] float32."""
    x2d = jnp.reshape(x, (-1, 3)).astype(jnp.float32)
    B = x2d.shape[0]
    w1, b1, w2, b2, w3, b3 = params

    # Map the batch onto a dense [rows, 128] slab (rows a multiple of 8
    # sublanes); tile the row axis so each grid step moves <= ~0.5 MiB.
    rows = _ceil_to(max(B, 1), LANES) // LANES
    rows = _ceil_to(rows, 8)
    rt = min(rows, max_rows_per_tile)          # rows per grid step (mult of 8)
    rows = _ceil_to(rows, rt)
    bpad = rows * LANES

    x_pad = jnp.zeros((bpad, 3), jnp.float32).at[:B].set(x2d)
    x_slab = x_pad.T.reshape(3, rows, LANES)   # [3, rows, 128] per-feature slabs

    smem = pl.BlockSpec(memory_space=pltpu.MemorySpace.SMEM)
    out = pl.pallas_call(
        distnet_kernel,
        out_shape=jax.ShapeDtypeStruct((rows, LANES), jnp.float32),
        grid=(rows // rt,),
        in_specs=[smem, smem, smem, smem, smem, smem,
                  pl.BlockSpec((3, rt, LANES), lambda i: (0, i, 0))],
        out_specs=pl.BlockSpec((rt, LANES), lambda i: (i, 0)),
        compiler_params=pltpu.CompilerParams(
            dimension_semantics=("parallel",)),
        cost_estimate=pl.CostEstimate(
            flops=90 * bpad,              # 45 MACs per batch element
            transcendentals=2 * bpad,     # exp + reciprocal
            bytes_accessed=16 * bpad),    # 12 B in + 4 B out per element
    )(w1, b1, w2, b2, w3, b3, x_slab)

    return out.reshape(bpad, 1)[:B]


def init_params(key):
    """PyTorch default Linear init: U(-1/sqrt(fan_in), 1/sqrt(fan_in))."""
    def linear(key, fan_in, fan_out):
        kw, kb = jax.random.split(key)
        bound = 1.0 / jnp.sqrt(jnp.float32(fan_in))
        # stored as [in, out] (transposed vs. torch's [out, in])
        w = jax.random.uniform(kw, (fan_in, fan_out), jnp.float32, -bound, bound)
        b = jax.random.uniform(kb, (fan_out,), jnp.float32, -bound, bound)
        return w, b

    k1, k2, k3 = jax.random.split(key, 3)
    w1, b1 = linear(k1, 3, 5)
    w2, b2 = linear(k2, 5, 5)
    w3, b3 = linear(k3, 5, 1)
    return (w1, b1, w2, b2, w3, b3)


def _reference_forward(x, params):
    # Pure-JAX reference for correctness checking.
    x2d = jnp.reshape(x, (-1, 3)).astype(jnp.float32)
    w1, b1, w2, b2, w3, b3 = params
    h = _leaky(x2d @ w1 + b1)
    h = _leaky(h @ w2 + b2)
    return jax.nn.sigmoid(h @ w3 + b3)


if __name__ == "__main__":
    key = jax.random.PRNGKey(0)
    k_params, k_x = jax.random.split(key)

    params = init_params(k_params)
    x = jax.random.normal(k_x, (8, 3), jnp.float32)   # batch of 8, features=3

    y = jax.block_until_ready(distnet_forward(x, params))
    y_ref = _reference_forward(x, params)

    assert y.shape == (8, 1)
    # Slightly loose tolerance: the sigmoid uses the EUP approx reciprocal.
    assert jnp.allclose(y, y_ref, atol=5e-3, rtol=5e-3), float(
        jnp.max(jnp.abs(y - y_ref)))

    print("KERNEL_OK")
</pallas_src>

<mosaic_0001>
module attributes {stable_mosaic.version = 11 : i64} {
  func.func @distnet_kernel(%arg0: i32, %arg1: memref<3x5xf32, #tpu.memory_space<smem>>, %arg2: memref<5xf32, #tpu.memory_space<smem>>, %arg3: memref<5x5xf32, #tpu.memory_space<smem>>, %arg4: memref<5xf32, #tpu.memory_space<smem>>, %arg5: memref<5x1xf32, #tpu.memory_space<smem>>, %arg6: memref<1xf32, #tpu.memory_space<smem>>, %arg7: memref<3x8x128xf32, #tpu.memory_space<vmem>>, %arg8: memref<8x128xf32, #tpu.memory_space<vmem>>) attributes {dimension_semantics = [#tpu.dimension_semantics<parallel>], iteration_bounds = array<i64: 1>, scalar_prefetch = 0 : i64, scratch_operands = 0 : i64, tpu.core_type = #tpu.core_type<tc>, window_params = [{transform_indices = @transform_0, window_bounds = array<i64: 3, 5>}, {transform_indices = @transform_1, window_bounds = array<i64: 5>}, {transform_indices = @transform_2, window_bounds = array<i64: 5, 5>}, {transform_indices = @transform_3, window_bounds = array<i64: 5>}, {transform_indices = @transform_4, window_bounds = array<i64: 5, 1>}, {transform_indices = @transform_5, window_bounds = array<i64: 1>}, {transform_indices = @transform_6, window_bounds = array<i64: 3, 8, 128>}, {transform_indices = @transform_7, window_bounds = array<i64: 8, 128>}]} {
    %c0 = arith.constant 0 : index
    %c0_0 = arith.constant 0 : index
    %c0_1 = arith.constant 0 : index
    %0 = vector.load %arg7[%c0, %c0_0, %c0_1] : memref<3x8x128xf32, #tpu.memory_space<vmem>>, vector<1x8x128xf32>
    %1 = vector.shape_cast %0 : vector<1x8x128xf32> to vector<8x128xf32>
    %c1 = arith.constant 1 : index
    %c0_2 = arith.constant 0 : index
    %c0_3 = arith.constant 0 : index
    %2 = vector.load %arg7[%c1, %c0_2, %c0_3] : memref<3x8x128xf32, #tpu.memory_space<vmem>>, vector<1x8x128xf32>
    %3 = vector.shape_cast %2 : vector<1x8x128xf32> to vector<8x128xf32>
    %c2 = arith.constant 2 : index
    %c0_4 = arith.constant 0 : index
    %c0_5 = arith.constant 0 : index
    %4 = vector.load %arg7[%c2, %c0_4, %c0_5] : memref<3x8x128xf32, #tpu.memory_space<vmem>>, vector<1x8x128xf32>
    %5 = vector.shape_cast %4 : vector<1x8x128xf32> to vector<8x128xf32>
    %c0_6 = arith.constant 0 : index
    %c0_7 = arith.constant 0 : index
    %6 = memref.load %arg1[%c0_6, %c0_7] : memref<3x5xf32, #tpu.memory_space<smem>>
    %7 = vector.broadcast %6 : f32 to vector<8x128xf32>
    %8 = arith.mulf %1, %7 : vector<8x128xf32>
    %c1_8 = arith.constant 1 : index
    %c0_9 = arith.constant 0 : index
    %9 = memref.load %arg1[%c1_8, %c0_9] : memref<3x5xf32, #tpu.memory_space<smem>>
    %10 = vector.broadcast %9 : f32 to vector<8x128xf32>
    %11 = arith.mulf %3, %10 : vector<8x128xf32>
    %12 = arith.addf %8, %11 : vector<8x128xf32>
    %c2_10 = arith.constant 2 : index
    %c0_11 = arith.constant 0 : index
    %13 = memref.load %arg1[%c2_10, %c0_11] : memref<3x5xf32, #tpu.memory_space<smem>>
    %14 = vector.broadcast %13 : f32 to vector<8x128xf32>
    %15 = arith.mulf %5, %14 : vector<8x128xf32>
    %16 = arith.addf %12, %15 : vector<8x128xf32>
    %c0_12 = arith.constant 0 : index
    %17 = memref.load %arg2[%c0_12] : memref<5xf32, #tpu.memory_space<smem>>
    %18 = vector.broadcast %17 : f32 to vector<8x128xf32>
    %19 = arith.addf %16, %18 : vector<8x128xf32>
    %cst = arith.constant 0.000000e+00 : f32
    %20 = vector.broadcast %cst : f32 to vector<8x128xf32>
    %21 = arith.cmpf oge, %19, %20 : vector<8x128xf32>
    %cst_13 = arith.constant 0.00999999977 : f32
    %22 = vector.broadcast %cst_13 : f32 to vector<8x128xf32>
    %23 = arith.mulf %22, %19 : vector<8x128xf32>
    %24 = arith.select %21, %19, %23 : vector<8x128xi1>, vector<8x128xf32>
    %c0_14 = arith.constant 0 : index
    %c1_15 = arith.constant 1 : index
    %25 = memref.load %arg1[%c0_14, %c1_15] : memref<3x5xf32, #tpu.memory_space<smem>>
    %26 = vector.broadcast %25 : f32 to vector<8x128xf32>
    %27 = arith.mulf %1, %26 : vector<8x128xf32>
    %c1_16 = arith.constant 1 : index
    %c1_17 = arith.constant 1 : index
    %28 = memref.load %arg1[%c1_16, %c1_17] : memref<3x5xf32, #tpu.memory_space<smem>>
    %29 = vector.broadcast %28 : f32 to vector<8x128xf32>
    %30 = arith.mulf %3, %29 : vector<8x128xf32>
    %31 = arith.addf %27, %30 : vector<8x128xf32>
    %c2_18 = arith.constant 2 : index
    %c1_19 = arith.constant 1 : index
    %32 = memref.load %arg1[%c2_18, %c1_19] : memref<3x5xf32, #tpu.memory_space<smem>>
    %33 = vector.broadcast %32 : f32 to vector<8x128xf32>
    %34 = arith.mulf %5, %33 : vector<8x128xf32>
    %35 = arith.addf %31, %34 : vector<8x128xf32>
    %c1_20 = arith.constant 1 : index
    %36 = memref.load %arg2[%c1_20] : memref<5xf32, #tpu.memory_space<smem>>
    %37 = vector.broadcast %36 : f32 to vector<8x128xf32>
    %38 = arith.addf %35, %37 : vector<8x128xf32>
    %cst_21 = arith.constant 0.000000e+00 : f32
    %39 = vector.broadcast %cst_21 : f32 to vector<8x128xf32>
    %40 = arith.cmpf oge, %38, %39 : vector<8x128xf32>
    %cst_22 = arith.constant 0.00999999977 : f32
    %41 = vector.broadcast %cst_22 : f32 to vector<8x128xf32>
    %42 = arith.mulf %41, %38 : vector<8x128xf32>
    %43 = arith.select %40, %38, %42 : vector<8x128xi1>, vector<8x128xf32>
    %c0_23 = arith.constant 0 : index
    %c2_24 = arith.constant 2 : index
    %44 = memref.load %arg1[%c0_23, %c2_24] : memref<3x5xf32, #tpu.memory_space<smem>>
    %45 = vector.broadcast %44 : f32 to vector<8x128xf32>
    %46 = arith.mulf %1, %45 : vector<8x128xf32>
    %c1_25 = arith.constant 1 : index
    %c2_26 = arith.constant 2 : index
    %47 = memref.load %arg1[%c1_25, %c2_26] : memref<3x5xf32, #tpu.memory_space<smem>>
    %48 = vector.broadcast %47 : f32 to vector<8x128xf32>
    %49 = arith.mulf %3, %48 : vector<8x128xf32>
    %50 = arith.addf %46, %49 : vector<8x128xf32>
    %c2_27 = arith.constant 2 : index
    %c2_28 = arith.constant 2 : index
    %51 = memref.load %arg1[%c2_27, %c2_28] : memref<3x5xf32, #tpu.memory_space<smem>>
    %52 = vector.broadcast %51 : f32 to vector<8x128xf32>
    %53 = arith.mulf %5, %52 : vector<8x128xf32>
    %54 = arith.addf %50, %53 : vector<8x128xf32>
    %c2_29 = arith.constant 2 : index
    %55 = memref.load %arg2[%c2_29] : memref<5xf32, #tpu.memory_space<smem>>
    %56 = vector.broadcast %55 : f32 to vector<8x128xf32>
    %57 = arith.addf %54, %56 : vector<8x128xf32>
    %cst_30 = arith.constant 0.000000e+00 : f32
    %58 = vector.broadcast %cst_30 : f32 to vector<8x128xf32>
    %59 = arith.cmpf oge, %57, %58 : vector<8x128xf32>
    %cst_31 = arith.constant 0.00999999977 : f32
    %60 = vector.broadcast %cst_31 : f32 to vector<8x128xf32>
    %61 = arith.mulf %60, %57 : vector<8x128xf32>
    %62 = arith.select %59, %57, %61 : vector<8x128xi1>, vector<8x128xf32>
    %c0_32 = arith.constant 0 : index
    %c3 = arith.constant 3 : index
    %63 = memref.load %arg1[%c0_32, %c3] : memref<3x5xf32, #tpu.memory_space<smem>>
    %64 = vector.broadcast %63 : f32 to vector<8x128xf32>
    %65 = arith.mulf %1, %64 : vector<8x128xf32>
    %c1_33 = arith.constant 1 : index
    %c3_34 = arith.constant 3 : index
    %66 = memref.load %arg1[%c1_33, %c3_34] : memref<3x5xf32, #tpu.memory_space<smem>>
    %67 = vector.broadcast %66 : f32 to vector<8x128xf32>
    %68 = arith.mulf %3, %67 : vector<8x128xf32>
    %69 = arith.addf %65, %68 : vector<8x128xf32>
    %c2_35 = arith.constant 2 : index
    %c3_36 = arith.constant 3 : index
    %70 = memref.load %arg1[%c2_35, %c3_36] : memref<3x5xf32, #tpu.memory_space<smem>>
    %71 = vector.broadcast %70 : f32 to vector<8x128xf32>
    %72 = arith.mulf %5, %71 : vector<8x128xf32>
    %73 = arith.addf %69, %72 : vector<8x128xf32>
    %c3_37 = arith.constant 3 : index
    %74 = memref.load %arg2[%c3_37] : memref<5xf32, #tpu.memory_space<smem>>
    %75 = vector.broadcast %74 : f32 to vector<8x128xf32>
    %76 = arith.addf %73, %75 : vector<8x128xf32>
    %cst_38 = arith.constant 0.000000e+00 : f32
    %77 = vector.broadcast %cst_38 : f32 to vector<8x128xf32>
    %78 = arith.cmpf oge, %76, %77 : vector<8x128xf32>
    %cst_39 = arith.constant 0.00999999977 : f32
    %79 = vector.broadcast %cst_39 : f32 to vector<8x128xf32>
    %80 = arith.mulf %79, %76 : vector<8x128xf32>
    %81 = arith.select %78, %76, %80 : vector<8x128xi1>, vector<8x128xf32>
    %c0_40 = arith.constant 0 : index
    %c4 = arith.constant 4 : index
    %82 = memref.load %arg1[%c0_40, %c4] : memref<3x5xf32, #tpu.memory_space<smem>>
    %83 = vector.broadcast %82 : f32 to vector<8x128xf32>
    %84 = arith.mulf %1, %83 : vector<8x128xf32>
    %c1_41 = arith.constant 1 : index
    %c4_42 = arith.constant 4 : index
    %85 = memref.load %arg1[%c1_41, %c4_42] : memref<3x5xf32, #tpu.memory_space<smem>>
    %86 = vector.broadcast %85 : f32 to vector<8x128xf32>
    %87 = arith.mulf %3, %86 : vector<8x128xf32>
    %88 = arith.addf %84, %87 : vector<8x128xf32>
    %c2_43 = arith.constant 2 : index
    %c4_44 = arith.constant 4 : index
    %89 = memref.load %arg1[%c2_43, %c4_44] : memref<3x5xf32, #tpu.memory_space<smem>>
    %90 = vector.broadcast %89 : f32 to vector<8x128xf32>
    %91 = arith.mulf %5, %90 : vector<8x128xf32>
    %92 = arith.addf %88, %91 : vector<8x128xf32>
    %c4_45 = arith.constant 4 : index
    %93 = memref.load %arg2[%c4_45] : memref<5xf32, #tpu.memory_space<smem>>
    %94 = vector.broadcast %93 : f32 to vector<8x128xf32>
    %95 = arith.addf %92, %94 : vector<8x128xf32>
    %cst_46 = arith.constant 0.000000e+00 : f32
    %96 = vector.broadcast %cst_46 : f32 to vector<8x128xf32>
    %97 = arith.cmpf oge, %95, %96 : vector<8x128xf32>
    %cst_47 = arith.constant 0.00999999977 : f32
    %98 = vector.broadcast %cst_47 : f32 to vector<8x128xf32>
    %99 = arith.mulf %98, %95 : vector<8x128xf32>
    %100 = arith.select %97, %95, %99 : vector<8x128xi1>, vector<8x128xf32>
    %c0_48 = arith.constant 0 : index
    %c0_49 = arith.constant 0 : index
    %101 = memref.load %arg3[%c0_48, %c0_49] : memref<5x5xf32, #tpu.memory_space<smem>>
    %102 = vector.broadcast %101 : f32 to vector<8x128xf32>
    %103 = arith.mulf %24, %102 : vector<8x128xf32>
    %c1_50 = arith.constant 1 : index
    %c0_51 = arith.constant 0 : index
    %104 = memref.load %arg3[%c1_50, %c0_51] : memref<5x5xf32, #tpu.memory_space<smem>>
    %105 = vector.broadcast %104 : f32 to vector<8x128xf32>
    %106 = arith.mulf %43, %105 : vector<8x128xf32>
    %107 = arith.addf %103, %106 : vector<8x128xf32>
    %c2_52 = arith.constant 2 : index
    %c0_53 = arith.constant 0 : index
    %108 = memref.load %arg3[%c2_52, %c0_53] : memref<5x5xf32, #tpu.memory_space<smem>>
    %109 = vector.broadcast %108 : f32 to vector<8x128xf32>
    %110 = arith.mulf %62, %109 : vector<8x128xf32>
    %111 = arith.addf %107, %110 : vector<8x128xf32>
    %c3_54 = arith.constant 3 : index
    %c0_55 = arith.constant 0 : index
    %112 = memref.load %arg3[%c3_54, %c0_55] : memref<5x5xf32, #tpu.memory_space<smem>>
    %113 = vector.broadcast %112 : f32 to vector<8x128xf32>
    %114 = arith.mulf %81, %113 : vector<8x128xf32>
    %115 = arith.addf %111, %114 : vector<8x128xf32>
    %c4_56 = arith.constant 4 : index
    %c0_57 = arith.constant 0 : index
    %116 = memref.load %arg3[%c4_56, %c0_57] : memref<5x5xf32, #tpu.memory_space<smem>>
    %117 = vector.broadcast %116 : f32 to vector<8x128xf32>
    %118 = arith.mulf %100, %117 : vector<8x128xf32>
    %119 = arith.addf %115, %118 : vector<8x128xf32>
    %c0_58 = arith.constant 0 : index
    %120 = memref.load %arg4[%c0_58] : memref<5xf32, #tpu.memory_space<smem>>
    %121 = vector.broadcast %120 : f32 to vector<8x128xf32>
    %122 = arith.addf %119, %121 : vector<8x128xf32>
    %cst_59 = arith.constant 0.000000e+00 : f32
    %123 = vector.broadcast %cst_59 : f32 to vector<8x128xf32>
    %124 = arith.cmpf oge, %122, %123 : vector<8x128xf32>
    %cst_60 = arith.constant 0.00999999977 : f32
    %125 = vector.broadcast %cst_60 : f32 to vector<8x128xf32>
    %126 = arith.mulf %125, %122 : vector<8x128xf32>
    %127 = arith.select %124, %122, %126 : vector<8x128xi1>, vector<8x128xf32>
    %c0_61 = arith.constant 0 : index
    %c1_62 = arith.constant 1 : index
    %128 = memref.load %arg3[%c0_61, %c1_62] : memref<5x5xf32, #tpu.memory_space<smem>>
    %129 = vector.broadcast %128 : f32 to vector<8x128xf32>
    %130 = arith.mulf %24, %129 : vector<8x128xf32>
    %c1_63 = arith.constant 1 : index
    %c1_64 = arith.constant 1 : index
    %131 = memref.load %arg3[%c1_63, %c1_64] : memref<5x5xf32, #tpu.memory_space<smem>>
    %132 = vector.broadcast %131 : f32 to vector<8x128xf32>
    %133 = arith.mulf %43, %132 : vector<8x128xf32>
    %134 = arith.addf %130, %133 : vector<8x128xf32>
    %c2_65 = arith.constant 2 : index
    %c1_66 = arith.constant 1 : index
    %135 = memref.load %arg3[%c2_65, %c1_66] : memref<5x5xf32, #tpu.memory_space<smem>>
    %136 = vector.broadcast %135 : f32 to vector<8x128xf32>
    %137 = arith.mulf %62, %136 : vector<8x128xf32>
    %138 = arith.addf %134, %137 : vector<8x128xf32>
    %c3_67 = arith.constant 3 : index
    %c1_68 = arith.constant 1 : index
    %139 = memref.load %arg3[%c3_67, %c1_68] : memref<5x5xf32, #tpu.memory_space<smem>>
    %140 = vector.broadcast %139 : f32 to vector<8x128xf32>
    %141 = arith.mulf %81, %140 : vector<8x128xf32>
    %142 = arith.addf %138, %141 : vector<8x128xf32>
    %c4_69 = arith.constant 4 : index
    %c1_70 = arith.constant 1 : index
    %143 = memref.load %arg3[%c4_69, %c1_70] : memref<5x5xf32, #tpu.memory_space<smem>>
    %144 = vector.broadcast %143 : f32 to vector<8x128xf32>
    %145 = arith.mulf %100, %144 : vector<8x128xf32>
    %146 = arith.addf %142, %145 : vector<8x128xf32>
    %c1_71 = arith.constant 1 : index
    %147 = memref.load %arg4[%c1_71] : memref<5xf32, #tpu.memory_space<smem>>
    %148 = vector.broadcast %147 : f32 to vector<8x128xf32>
    %149 = arith.addf %146, %148 : vector<8x128xf32>
    %cst_72 = arith.constant 0.000000e+00 : f32
    %150 = vector.broadcast %cst_72 : f32 to vector<8x128xf32>
    %151 = arith.cmpf oge, %149, %150 : vector<8x128xf32>
    %cst_73 = arith.constant 0.00999999977 : f32
    %152 = vector.broadcast %cst_73 : f32 to vector<8x128xf32>
    %153 = arith.mulf %152, %149 : vector<8x128xf32>
    %154 = arith.select %151, %149, %153 : vector<8x128xi1>, vector<8x128xf32>
    %c0_74 = arith.constant 0 : index
    %c2_75 = arith.constant 2 : index
    %155 = memref.load %arg3[%c0_74, %c2_75] : memref<5x5xf32, #tpu.memory_space<smem>>
    %156 = vector.broadcast %155 : f32 to vector<8x128xf32>
    %157 = arith.mulf %24, %156 : vector<8x128xf32>
    %c1_76 = arith.constant 1 : index
    %c2_77 = arith.constant 2 : index
    %158 = memref.load %arg3[%c1_76, %c2_77] : memref<5x5xf32, #tpu.memory_space<smem>>
    %159 = vector.broadcast %158 : f32 to vector<8x128xf32>
    %160 = arith.mulf %43, %159 : vector<8x128xf32>
    %161 = arith.addf %157, %160 : vector<8x128xf32>
    %c2_78 = arith.constant 2 : index
    %c2_79 = arith.constant 2 : index
    %162 = memref.load %arg3[%c2_78, %c2_79] : memref<5x5xf32, #tpu.memory_space<smem>>
    %163 = vector.broadcast %162 : f32 to vector<8x128xf32>
    %164 = arith.mulf %62, %163 : vector<8x128xf32>
    %165 = arith.addf %161, %164 : vector<8x128xf32>
    %c3_80 = arith.constant 3 : index
    %c2_81 = arith.constant 2 : index
    %166 = memref.load %arg3[%c3_80, %c2_81] : memref<5x5xf32, #tpu.memory_space<smem>>
    %167 = vector.broadcast %166 : f32 to vector<8x128xf32>
    %168 = arith.mulf %81, %167 : vector<8x128xf32>
    %169 = arith.addf %165, %168 : vector<8x128xf32>
    %c4_82 = arith.constant 4 : index
    %c2_83 = arith.constant 2 : index
    %170 = memref.load %arg3[%c4_82, %c2_83] : memref<5x5xf32, #tpu.memory_space<smem>>
    %171 = vector.broadcast %170 : f32 to vector<8x128xf32>
    %172 = arith.mulf %100, %171 : vector<8x128xf32>
    %173 = arith.addf %169, %172 : vector<8x128xf32>
    %c2_84 = arith.constant 2 : index
    %174 = memref.load %arg4[%c2_84] : memref<5xf32, #tpu.memory_space<smem>>
    %175 = vector.broadcast %174 : f32 to vector<8x128xf32>
    %176 = arith.addf %173, %175 : vector<8x128xf32>
    %cst_85 = arith.constant 0.000000e+00 : f32
    %177 = vector.broadcast %cst_85 : f32 to vector<8x128xf32>
    %178 = arith.cmpf oge, %176, %177 : vector<8x128xf32>
    %cst_86 = arith.constant 0.00999999977 : f32
    %179 = vector.broadcast %cst_86 : f32 to vector<8x128xf32>
    %180 = arith.mulf %179, %176 : vector<8x128xf32>
    %181 = arith.select %178, %176, %180 : vector<8x128xi1>, vector<8x128xf32>
    %c0_87 = arith.constant 0 : index
    %c3_88 = arith.constant 3 : index
    %182 = memref.load %arg3[%c0_87, %c3_88] : memref<5x5xf32, #tpu.memory_space<smem>>
    %183 = vector.broadcast %182 : f32 to vector<8x128xf32>
    %184 = arith.mulf %24, %183 : vector<8x128xf32>
    %c1_89 = arith.constant 1 : index
    %c3_90 = arith.constant 3 : index
    %185 = memref.load %arg3[%c1_89, %c3_90] : memref<5x5xf32, #tpu.memory_space<smem>>
    %186 = vector.broadcast %185 : f32 to vector<8x128xf32>
    %187 = arith.mulf %43, %186 : vector<8x128xf32>
    %188 = arith.addf %184, %187 : vector<8x128xf32>
    %c2_91 = arith.constant 2 : index
    %c3_92 = arith.constant 3 : index
    %189 = memref.load %arg3[%c2_91, %c3_92] : memref<5x5xf32, #tpu.memory_space<smem>>
    %190 = vector.broadcast %189 : f32 to vector<8x128xf32>
    %191 = arith.mulf %62, %190 : vector<8x128xf32>
    %192 = arith.addf %188, %191 : vector<8x128xf32>
    %c3_93 = arith.constant 3 : index
    %c3_94 = arith.constant 3 : index
    %193 = memref.load %arg3[%c3_93, %c3_94] : memref<5x5xf32, #tpu.memory_space<smem>>
    %194 = vector.broadcast %193 : f32 to vector<8x128xf32>
    %195 = arith.mulf %81, %194 : vector<8x128xf32>
    %196 = arith.addf %192, %195 : vector<8x128xf32>
    %c4_95 = arith.constant 4 : index
    %c3_96 = arith.constant 3 : index
    %197 = memref.load %arg3[%c4_95, %c3_96] : memref<5x5xf32, #tpu.memory_space<smem>>
    %198 = vector.broadcast %197 : f32 to vector<8x128xf32>
    %199 = arith.mulf %100, %198 : vector<8x128xf32>
    %200 = arith.addf %196, %199 : vector<8x128xf32>
    %c3_97 = arith.constant 3 : index
    %201 = memref.load %arg4[%c3_97] : memref<5xf32, #tpu.memory_space<smem>>
    %202 = vector.broadcast %201 : f32 to vector<8x128xf32>
    %203 = arith.addf %200, %202 : vector<8x128xf32>
    %cst_98 = arith.constant 0.000000e+00 : f32
    %204 = vector.broadcast %cst_98 : f32 to vector<8x128xf32>
    %205 = arith.cmpf oge, %203, %204 : vector<8x128xf32>
    %cst_99 = arith.constant 0.00999999977 : f32
    %206 = vector.broadcast %cst_99 : f32 to vector<8x128xf32>
    %207 = arith.mulf %206, %203 : vector<8x128xf32>
    %208 = arith.select %205, %203, %207 : vector<8x128xi1>, vector<8x128xf32>
    %c0_100 = arith.constant 0 : index
    %c4_101 = arith.constant 4 : index
    %209 = memref.load %arg3[%c0_100, %c4_101] : memref<5x5xf32, #tpu.memory_space<smem>>
    %210 = vector.broadcast %209 : f32 to vector<8x128xf32>
    %211 = arith.mulf %24, %210 : vector<8x128xf32>
    %c1_102 = arith.constant 1 : index
    %c4_103 = arith.constant 4 : index
    %212 = memref.load %arg3[%c1_102, %c4_103] : memref<5x5xf32, #tpu.memory_space<smem>>
    %213 = vector.broadcast %212 : f32 to vector<8x128xf32>
    %214 = arith.mulf %43, %213 : vector<8x128xf32>
    %215 = arith.addf %211, %214 : vector<8x128xf32>
    %c2_104 = arith.constant 2 : index
    %c4_105 = arith.constant 4 : index
    %216 = memref.load %arg3[%c2_104, %c4_105] : memref<5x5xf32, #tpu.memory_space<smem>>
    %217 = vector.broadcast %216 : f32 to vector<8x128xf32>
    %218 = arith.mulf %62, %217 : vector<8x128xf32>
    %219 = arith.addf %215, %218 : vector<8x128xf32>
    %c3_106 = arith.constant 3 : index
    %c4_107 = arith.constant 4 : index
    %220 = memref.load %arg3[%c3_106, %c4_107] : memref<5x5xf32, #tpu.memory_space<smem>>
    %221 = vector.broadcast %220 : f32 to vector<8x128xf32>
    %222 = arith.mulf %81, %221 : vector<8x128xf32>
    %223 = arith.addf %219, %222 : vector<8x128xf32>
    %c4_108 = arith.constant 4 : index
    %c4_109 = arith.constant 4 : index
    %224 = memref.load %arg3[%c4_108, %c4_109] : memref<5x5xf32, #tpu.memory_space<smem>>
    %225 = vector.broadcast %224 : f32 to vector<8x128xf32>
    %226 = arith.mulf %100, %225 : vector<8x128xf32>
    %227 = arith.addf %223, %226 : vector<8x128xf32>
    %c4_110 = arith.constant 4 : index
    %228 = memref.load %arg4[%c4_110] : memref<5xf32, #tpu.memory_space<smem>>
    %229 = vector.broadcast %228 : f32 to vector<8x128xf32>
    %230 = arith.addf %227, %229 : vector<8x128xf32>
    %cst_111 = arith.constant 0.000000e+00 : f32
    %231 = vector.broadcast %cst_111 : f32 to vector<8x128xf32>
    %232 = arith.cmpf oge, %230, %231 : vector<8x128xf32>
    %cst_112 = arith.constant 0.00999999977 : f32
    %233 = vector.broadcast %cst_112 : f32 to vector<8x128xf32>
    %234 = arith.mulf %233, %230 : vector<8x128xf32>
    %235 = arith.select %232, %230, %234 : vector<8x128xi1>, vector<8x128xf32>
    %c0_113 = arith.constant 0 : index
    %c0_114 = arith.constant 0 : index
    %236 = memref.load %arg5[%c0_113, %c0_114] : memref<5x1xf32, #tpu.memory_space<smem>>
    %237 = vector.broadcast %236 : f32 to vector<8x128xf32>
    %238 = arith.mulf %127, %237 : vector<8x128xf32>
    %c1_115 = arith.constant 1 : index
    %c0_116 = arith.constant 0 : index
    %239 = memref.load %arg5[%c1_115, %c0_116] : memref<5x1xf32, #tpu.memory_space<smem>>
    %240 = vector.broadcast %239 : f32 to vector<8x128xf32>
    %241 = arith.mulf %154, %240 : vector<8x128xf32>
    %242 = arith.addf %238, %241 : vector<8x128xf32>
    %c2_117 = arith.constant 2 : index
    %c0_118 = arith.constant 0 : index
    %243 = memref.load %arg5[%c2_117, %c0_118] : memref<5x1xf32, #tpu.memory_space<smem>>
    %244 = vector.broadcast %243 : f32 to vector<8x128xf32>
    %245 = arith.mulf %181, %244 : vector<8x128xf32>
    %246 = arith.addf %242, %245 : vector<8x128xf32>
    %c3_119 = arith.constant 3 : index
    %c0_120 = arith.constant 0 : index
    %247 = memref.load %arg5[%c3_119, %c0_120] : memref<5x1xf32, #tpu.memory_space<smem>>
    %248 = vector.broadcast %247 : f32 to vector<8x128xf32>
    %249 = arith.mulf %208, %248 : vector<8x128xf32>
    %250 = arith.addf %246, %249 : vector<8x128xf32>
    %c4_121 = arith.constant 4 : index
    %c0_122 = arith.constant 0 : index
    %251 = memref.load %arg5[%c4_121, %c0_122] : memref<5x1xf32, #tpu.memory_space<smem>>
    %252 = vector.broadcast %251 : f32 to vector<8x128xf32>
    %253 = arith.mulf %235, %252 : vector<8x128xf32>
    %254 = arith.addf %250, %253 : vector<8x128xf32>
    %c0_123 = arith.constant 0 : index
    %255 = memref.load %arg6[%c0_123] : memref<1xf32, #tpu.memory_space<smem>>
    %256 = vector.broadcast %255 : f32 to vector<8x128xf32>
    %257 = arith.addf %254, %256 : vector<8x128xf32>
    %cst_124 = arith.constant 0.000000e+00 : f32
    %258 = vector.broadcast %cst_124 : f32 to vector<8x128xf32>
    %259 = arith.subf %258, %257 : vector<8x128xf32>
    %260 = math.exp %259 : vector<8x128xf32>
    %cst_125 = arith.constant 1.000000e+00 : f32
    %261 = vector.broadcast %cst_125 : f32 to vector<8x128xf32>
    %262 = arith.addf %261, %260 : vector<8x128xf32>
    %263 = tpu.reciprocal %262 {approx = true} : vector<8x128xf32> -> vector<8x128xf32>
    %c0_126 = arith.constant 0 : index
    %c0_127 = arith.constant 0 : index
    %264 = vector.load %arg8[%c0_126, %c0_127] : memref<8x128xf32, #tpu.memory_space<vmem>>, vector<8x128xf32>
    tpu.vector_store %arg8[%c0_126, %c0_127], %263 {strides = array<i32>} : memref<8x128xf32, #tpu.memory_space<vmem>>, vector<8x128xf32>,
    return
  }
  func.func @transform_0(%arg0: i32) -> (i32, i32) {
    %c0_i32 = arith.constant 0 : i32
    %c0_i32_0 = arith.constant 0 : i32
    %c0_i32_1 = arith.constant 0 : i32
    return %c0_i32, %c0_i32_0 : i32, i32
  }
  func.func @transform_1(%arg0: i32) -> i32 {
    %c0_i32 = arith.constant 0 : i32
    %c0_i32_0 = arith.constant 0 : i32
    return %c0_i32 : i32
  }
  func.func @transform_2(%arg0: i32) -> (i32, i32) {
    %c0_i32 = arith.constant 0 : i32
    %c0_i32_0 = arith.constant 0 : i32
    %c0_i32_1 = arith.constant 0 : i32
    return %c0_i32, %c0_i32_0 : i32, i32
  }
  func.func @transform_3(%arg0: i32) -> i32 {
    %c0_i32 = arith.constant 0 : i32
    %c0_i32_0 = arith.constant 0 : i32
    return %c0_i32 : i32
  }
  func.func @transform_4(%arg0: i32) -> (i32, i32) {
    %c0_i32 = arith.constant 0 : i32
    %c0_i32_0 = arith.constant 0 : i32
    %c0_i32_1 = arith.constant 0 : i32
    return %c0_i32, %c0_i32_0 : i32, i32
  }
  func.func @transform_5(%arg0: i32) -> i32 {
    %c0_i32 = arith.constant 0 : i32
    %c0_i32_0 = arith.constant 0 : i32
    return %c0_i32 : i32
  }
  func.func @transform_6(%arg0: i32) -> (i32, i32, i32) {
    %c0_i32 = arith.constant 0 : i32
    %c0_i32_0 = arith.constant 0 : i32
    %c0_i32_1 = arith.constant 0 : i32
    return %c0_i32, %arg0, %c0_i32_0 : i32, i32, i32
  }
  func.func @transform_7(%arg0: i32) -> (i32, i32) {
    %c0_i32 = arith.constant 0 : i32
    %c0_i32_0 = arith.constant 0 : i32
    return %arg0, %c0_i32 : i32, i32
  }
}

</mosaic_0001>

<bundles_post_ra>
// kernel: tpu_custom_call.1
= control target key start
LH: loop header
LB: loop body
LE: loop exit
PB: predicated region body
PF: predicated region fallthrough
CT: control target
= control target key end

     0   :  { %13 = vsyncpa [#allocation7], 0  ;;  %s734_s0 = inlined_call_operand.vmem [shape: f32[3,5], index: 0, kind: input, shape index: {}]   ;;  %s735_s1 = inlined_call_operand.hbm [shape: f32[5], index: 1, kind: input, shape index: {}]   ;;  %s736_s2 = inlined_call_operand.vmem [shape: f32[5,5], index: 2, kind: input, shape index: {}]   ;;  %s737_s3 = inlined_call_operand.vmem [shape: f32[5], index: 3, kind: input, shape index: {}]   ;;  %s738_s4 = inlined_call_operand.vmem [shape: f32[5,1], index: 4, kind: input, shape index: {}]   ;;  %s739_s5 = inlined_call_operand.<no memory space> [shape: f32[1], index: 5, kind: input, shape index: {}]   ;;  %s740_s6 = inlined_call_operand.hbm [shape: f32[3,8,128], index: 6, kind: input, shape index: {}]   ;;  %s741_s7 = inlined_call_operand.hbm [shape: f32[8,128], index: 7, kind: output, shape index: {}]  }
   0x1   :  { %14 = vsyncpa [#allocation6], 0 }
   0x2   :  { %15 = vsyncpa [#allocation10], 0 }
   0x3   :  { %16 = vsyncpa [#allocation13], 0 }
   0x4   :  { %17 = vsyncpa [#allocation4], 0  ;;  %s42_s26 = sshll.u32 %s736_s2, 4  ;;  %s43_s26 = int_to_ptr.vmem [resolvable:$true] %s42_s26 }
   0x5   :  { %18 = vsyncpa [#allocation5], 0  ;;  %s24_s29 = sshll.u32 %s734_s0, 4  ;;  %s551_s30 = smov [#allocation9]   ;;  %s25_s29 = int_to_ptr.vmem [resolvable:$true] %s24_s29 }
   0x6   :  { %45 = dma.vmem_to_smem %s43_s26, 128, %s551_s30, [#allocation10]  }
   0x7   :  { %s552_s8 = smov [#allocation3]   ;;  %s33_s11 = sshll.u32 %s735_s1, 4  ;;  %s34_s11 = int_to_ptr.hbm [resolvable:$true] %s33_s11 }
   0x8   :  { %27 = dma.vmem_to_smem %s25_s29, 64, %s552_s8, [#allocation7]  }
   0x9   :  { %s51_s2 = sshll.u32 %s737_s3, 4  ;;  %s553_s14 = smov [#allocation8]   ;;  %s52_s2 = int_to_ptr.vmem [resolvable:$true] %s51_s2 }
   0xa   :  { %36 = dma.hbm_to_smem %s34_s11, 16, %s553_s14, [#allocation6]  }
   0xb   :  { %s554_s15 = smov [#allocation11]   ;;  %s60_s17 = sshll.u32 %s738_s4, 4  ;;  %s61_s17 = int_to_ptr.vmem [resolvable:$true] %s60_s17 }
   0xc   :  { %54 = dma.vmem_to_smem %s52_s2, 16, %s554_s15, [#allocation10]  }
   0xd   :  { %s70_s20 = sshll.u32 %s740_s6, 4  ;;  %s555_s1 = smov [#allocation12]   ;;  %s71_s20 = int_to_ptr.hbm [resolvable:$true] %s70_s20 }
   0xe   :  { %63 = dma.vmem_to_smem %s61_s17, 128, %s555_s1, [#allocation13]  }
   0xf   :  { %s556_s21 = smov [#allocation14]   ;;  %s557_s3 = smov 128  }
  0x10   :  { %s72_s22 = sshll.u32 %s556_s21, 4  ;;  %s558_s23 = smov 8   ;;  %s73_s22 = int_to_ptr.vmem [resolvable:$true] %s72_s22 }
  0x11   :  { %78 = dma.hbm_to_vmem [thread:$0]  %s71_s20, 384, %s73_s22, [#allocation4], %s557_s3, %s557_s3, %s558_s23  }
  0x12   :  { %539 = dma.done.wait [#allocation7], 64  }
  0x13   :  { %540 = vsyncadd [#allocation7], 4294967232 }
  0x14   :  { %541 = dma.done.wait [#allocation6], 16  }
  0x15   :  { %542 = vsyncadd [#allocation6], 4294967280 }
  0x16   :  { %543 = dma.done.wait [#allocation10], 144  }
  0x17   :  { %544 = vsyncadd [#allocation10], 4294967152 }
  0x18   :  { %545 = dma.done.wait [#allocation13], 128  }
  0x19   :  { %546 = vsyncadd [#allocation13], 4294967168 }
  0x1a   :  { %547 = dma.done.wait [#allocation4], 384  }
  0x1b   :  { %548 = vsyncadd [#allocation4], 4294966912 }
  0x1c   :  { %103 = sfence }
  0x1d   :  { %s109_s4 = sld [smem:[#allocation3]]  ;;  %v618_v0 = vld [vmem:[#allocation14] sm:$0xff]  ;;  %v620_v1 = vld [vmem:[#allocation14 + $0x8] sm:$0xff]  ;;  %v622_v2 = vld [vmem:[#allocation14 + $0x10] sm:$0xff] }
  0x1e   :  { %s368_s6 = sld [smem:[#allocation3 + $0x80]] }
  0x1f   :  { %s369_s24 = sld [smem:[#allocation3 + $0x100]] }
  0x20   :  { %s120_s25 = sld [smem:[#allocation8]] }
  0x21   :  { %s370_s26 = sld [smem:[#allocation3 + $0x1]] }
  0x22   :  { %s371_s27 = sld [smem:[#allocation3 + $0x81]] }
  0x23   :  { %v110_v3 = vstv %s109_s4  ;;  %s372_s28 = sld [smem:[#allocation3 + $0x101]] }
  0x24   :  { %v111_v4 = vmul.f32 %v110_v3, %v618_v0  ;;  %v113_v5 = vstv %s368_s6  ;;  %s625_s29 = sld [smem:[#allocation8 + $0x1]] }
  0x25   :  { %v114_v6 = vmul.f32 %v113_v5, %v620_v1  ;;  %v117_v7 = vstv %s369_s24  ;;  %s374_s30 = sld [smem:[#allocation3 + $0x2]] }
  0x26   :  { %v118_v8 = vmul.f32 %v117_v7, %v622_v2  ;;  %s375_s8 = sld [smem:[#allocation3 + $0x82]]  ;;  %v121_v11 = vstv %s120_s25 }
  0x27   :  { %v115_v9 = vadd.f32 %v114_v6, %v111_v4  ;;  %v127_v10 = vstv %s370_s26  ;;  %s376_s9 = sld [smem:[#allocation3 + $0x102]] }
  0x28   :  { %v128_v12 = vmul.f32 %v127_v10, %v618_v0  ;;  %v130_v13 = vstv %s371_s27  ;;  %s630_s10 = sld [smem:[#allocation8 + $0x2]] }
  0x29   :  { %v119_v14 = vadd.f32 %v118_v8, %v115_v9  ;;  %v131_v15 = vmul.f32 %v130_v13, %v620_v1  ;;  %v134_v16 = vstv %s372_s28  ;;  %s378_s11 = sld [smem:[#allocation3 + $0x3]] }
  0x2a   :  { %v135_v17 = vmul.f32 %v134_v16, %v622_v2  ;;  %s379_s12 = sld [smem:[#allocation3 + $0x83]]  ;;  %v138_v21 = vstv %s625_s29 }
  0x2b   :  { %v122_v18 = vadd.f32 %v121_v11, %v119_v14  ;;  %v132_v19 = vadd.f32 %v131_v15, %v128_v12  ;;  %v144_v20 = vstv %s374_s30  ;;  %s380_s13 = sld [smem:[#allocation3 + $0x103]] }
  0x2c   :  { %v145_v22 = vmul.f32 %v144_v20, %v618_v0  ;;  %v147_v23 = vstv %s375_s8  ;;  %s636_s2 = sld [smem:[#allocation8 + $0x3]] }
  0x2d   :  { %v136_v24 = vadd.f32 %v135_v17, %v132_v19  ;;  %v148_v25 = vmul.f32 %v147_v23, %v620_v1  ;;  %s382_s14 = sld [smem:[#allocation3 + $0x4]]  ;;  %v124_v26 = vmul.f32 0.01, %v122_v18  ;;  %v151_v27 = vstv %s376_s9 }
  0x2e   :  { %s383_s15 = sld [smem:[#allocation3 + $0x84]]  ;;  %vm123_vm0 = vcmp.ge.f32.partialorder %v122_v18, 0.0  ;;  %v152_v30 = vmul.f32 %v151_v27, %v622_v2  ;;  %v155_v31 = vstv %s630_s10 }
  0x2f   :  { %v139_v28 = vadd.f32 %v138_v21, %v136_v24  ;;  %v149_v29 = vadd.f32 %v148_v25, %v145_v22  ;;  %s384_s0 = sld [smem:[#allocation3 + $0x104]]  ;;  %v161_v32 = vstv %s378_s11  ;;  %v646_v36 = vsel %vm123_vm0, %v122_v18, %v124_v26 }
  0x30   :  { %v164_v33 = vstv %s379_s12  ;;  %s641_s16 = sld [smem:[#allocation8 + $0x4]]  ;;  %v162_v35 = vmul.f32 %v161_v32, %v618_v0 }
  0x31   :  { %v153_v34 = vadd.f32 %v152_v30, %v149_v29  ;;  %s644_s17 = sld [smem:[#allocation9]]  ;;  %v141_v37 = vmul.f32 0.01, %v139_v28  ;;  %v165_v38 = vmul.f32 %v164_v33, %v620_v1  ;;  %v168_v39 = vstv %s380_s13 }
  0x32   :  { %s386_s18 = sld [smem:[#allocation9 + $0x80]]  ;;  %vm140_vm1 = vcmp.ge.f32.partialorder %v139_v28, 0.0  ;;  %v169_v41 = vmul.f32 %v168_v39, %v622_v2  ;;  %v172_v44 = vstv %s636_s2 }
  0x33   :  { %v156_v40 = vadd.f32 %v155_v31, %v153_v34  ;;  %v178_v42 = vstv %s382_s14  ;;  %s387_s19 = sld [smem:[#allocation9 + $0x100]]  ;;  %v166_v43 = vadd.f32 %v165_v38, %v162_v35  ;;  %v657_v50 = vsel %vm140_vm1, %v139_v28, %v141_v37 }
  0x34   :  { %v179_v45 = vmul.f32 %v178_v42, %v618_v0  ;;  %v181_v46 = vstv %s383_s15  ;;  %s652_s20 = sld [smem:[#allocation9 + $0x180]] }
  0x35   :  { %vm157_vm2 = vcmp.ge.f32.partialorder %v156_v40, 0.0  ;;  %v158_v47 = vmul.f32 0.01, %v156_v40  ;;  %v182_v48 = vmul.f32 %v181_v46, %v620_v1  ;;  %v185_v49 = vstv %s384_s0  ;;  %s655_s1 = sld [smem:[#allocation9 + $0x200]] }
  0x36   :  { %v170_v51 = vadd.f32 %v169_v41, %v166_v43  ;;  %v186_v52 = vmul.f32 %v185_v49, %v622_v2  ;;  %s660_s21 = sld [smem:[#allocation11]]  ;;  %v189_v57 = vstv %s641_s16 }
  0x37   :  { %v662_v53 = vsel %vm157_vm2, %v156_v40, %v158_v47  ;;  %v183_v54 = vadd.f32 %v182_v48, %v179_v45  ;;  %v195_v55 = vstv %s644_s17  ;;  %s390_s22 = sld [smem:[#allocation9 + $0x1]] }
  0x38   :  { %v173_v56 = vadd.f32 %v172_v44, %v170_v51  ;;  %v196_v58 = vmul.f32 %v195_v55, %v646_v36  ;;  %v198_v59 = vstv %s386_s18  ;;  %s391_s3 = sld [smem:[#allocation9 + $0x81]] }
  0x39   :  { %v187_v60 = vadd.f32 %v186_v52, %v183_v54  ;;  %v199_v61 = vmul.f32 %v198_v59, %v657_v50  ;;  %v202_v62 = vstv %s387_s19  ;;  %s392_s23 = sld [smem:[#allocation9 + $0x101]] }
  0x3a   :  { %vm174_vm3 = vcmp.ge.f32.partialorder %v173_v56, 0.0  ;;  %v175_v63 = vmul.f32 0.01, %v173_v56  ;;  %v203_v0 = vmul.f32 %v202_v62, %v662_v53  ;;  %v206_v1 = vstv %s652_s20  ;;  %s393_s4 = sld [smem:[#allocation9 + $0x181]] }
  0x3b   :  { %v190_v2 = vadd.f32 %v189_v57, %v187_v60  ;;  %v200_v3 = vadd.f32 %v199_v61, %v196_v58  ;;  %s394_s6 = sld [smem:[#allocation9 + $0x201]]  ;;  %v210_v5 = vstv %s655_s1 }
  0x3c   :  { %v670_v4 = vsel %vm174_vm3, %v173_v56, %v175_v63  ;;  %s673_s24 = sld [smem:[#allocation11 + $0x1]]  ;;  %v214_v31 = vstv %s660_s21 }
  0x3d   :  { %vm191_vm4 = vcmp.ge.f32.partialorder %v190_v2, 0.0  ;;  %v192_v6 = vmul.f32 0.01, %v190_v2  ;;  %v204_v7 = vadd.f32 %v203_v0, %v200_v3  ;;  %v207_v8 = vmul.f32 %v206_v1, %v670_v4  ;;  %s396_s25 = sld [smem:[#allocation9 + $0x2]] }
  0x3e   :  { %v220_v9 = vstv %s390_s22  ;;  %v223_v10 = vstv %s391_s3  ;;  %s397_s26 = sld [smem:[#allocation9 + $0x82]] }
  0x3f   :  { %v676_v11 = vsel %vm191_vm4, %v190_v2, %v192_v6  ;;  %v221_v12 = vmul.f32 %v220_v9, %v646_v36  ;;  %v224_v13 = vmul.f32 %v223_v10, %v657_v50  ;;  %s398_s27 = sld [smem:[#allocation9 + $0x102]]  ;;  %v208_v14 = vadd.f32 %v207_v8, %v204_v7 }
  0x40   :  { %v211_v15 = vmul.f32 %v210_v5, %v676_v11  ;;  %v227_v16 = vstv %s392_s23  ;;  %v231_v17 = vstv %s393_s4  ;;  %s399_s28 = sld [smem:[#allocation9 + $0x182]]  ;;  %s559_s23 = smov [#allocation15]  }
  0x41   :  { %v225_v18 = vadd.f32 %v224_v13, %v221_v12  ;;  %v228_v19 = vmul.f32 %v227_v16, %v662_v53  ;;  %v232_v20 = vmul.f32 %v231_v17, %v670_v4  ;;  %v235_v21 = vstv %s394_s6  ;;  %s400_s29 = sld [smem:[#allocation9 + $0x202]]  ;;  %s352_s4 = sshll.u32 %s559_s23, 4  ;;  %s353_s4 = int_to_ptr.vmem [resolvable:$true] %s352_s4 }
  0x42   :  { %s683_s30 = sld [smem:[#allocation11 + $0x2]]  ;;  %v236_v24 = vmul.f32 %v235_v21, %v676_v11  ;;  %v212_v27 = vadd.f32 %v211_v15, %v208_v14  ;;  %v239_v39 = vstv %s673_s24 }
  0x43   :  { %v229_v22 = vadd.f32 %v228_v19, %v225_v18  ;;  %v245_v23 = vstv %s396_s25  ;;  %s402_s8 = sld [smem:[#allocation9 + $0x3]]  ;;  %s354_s25 = sshll.u32 %s741_s7, 4  ;;  %s355_s25 = int_to_ptr.hbm [resolvable:$true] %s354_s25 }
  0x44   :  { %v246_v25 = vmul.f32 %v245_v23, %v646_v36  ;;  %v248_v26 = vstv %s397_s26  ;;  %s403_s9 = sld [smem:[#allocation9 + $0x83]]  ;;  %v215_v40 = vadd.f32 %v214_v31, %v212_v27 }
  0x45   :  { %v233_v28 = vadd.f32 %v232_v20, %v229_v22  ;;  %v249_v29 = vmul.f32 %v248_v26, %v657_v50  ;;  %v252_v30 = vstv %s398_s27  ;;  %s688_s10 = sld [smem:[#allocation9 + $0x103]] }
  0x46   :  { %v253_v32 = vmul.f32 %v252_v30, %v662_v53  ;;  %v256_v33 = vstv %s399_s28  ;;  %s405_s11 = sld [smem:[#allocation9 + $0x183]]  ;;  %v217_v54 = vmul.f32 0.01, %v215_v40  ;;  %vm216_vm5 = vcmp.ge.f32.partialorder %v215_v40, 0.0 }
  0x47   :  { %v250_v34 = vadd.f32 %v249_v29, %v246_v25  ;;  %v257_v35 = vmul.f32 %v256_v33, %v670_v4  ;;  %v260_v37 = vstv %s400_s29  ;;  %s693_s12 = sld [smem:[#allocation9 + $0x203]]  ;;  %v237_v38 = vadd.f32 %v236_v24, %v233_v28 }
  0x48   :  { %s696_s13 = sld [smem:[#allocation11 + $0x3]]  ;;  %v261_v42 = vmul.f32 %v260_v37, %v676_v11  ;;  %v264_v49 = vstv %s683_s30  ;;  %v218_v3 = vsel %vm216_vm5, %v215_v40, %v217_v54 }
  0x49   :  { %v254_v41 = vadd.f32 %v253_v32, %v250_v34  ;;  %v270_v43 = vstv %s402_s8  ;;  %s408_s2 = sld [smem:[#allocation9 + $0x4]]  ;;  %v240_v48 = vadd.f32 %v239_v39, %v237_v38  ;;  %v339_v39 = vstv %s739_s5 }
  0x4a   :  { %v271_v44 = vmul.f32 %v270_v43, %v646_v36  ;;  %v273_v45 = vstv %s403_s9  ;;  %s409_s14 = sld [smem:[#allocation9 + $0x84]] }
  0x4b   :  { %v258_v46 = vadd.f32 %v257_v35, %v254_v41  ;;  %v274_v47 = vmul.f32 %v273_v45, %v657_v50  ;;  %s701_s15 = sld [smem:[#allocation9 + $0x104]]  ;;  %v277_v51 = vstv %s688_s10  ;;  %v242_v0 = vmul.f32 0.01, %v240_v48 }
  0x4c   :  { %v281_v52 = vstv %s405_s11  ;;  %s705_s0 = sld [smem:[#allocation9 + $0x184]]  ;;  %v278_v57 = vmul.f32 %v277_v51, %v662_v53  ;;  %vm241_vm6 = vcmp.ge.f32.partialorder %v240_v48, 0.0 }
  0x4d   :  { %v262_v55 = vadd.f32 %v261_v42, %v258_v46  ;;  %v275_v56 = vadd.f32 %v274_v47, %v271_v44  ;;  %s708_s16 = sld [smem:[#allocation9 + $0x204]]  ;;  %v282_v58 = vmul.f32 %v281_v52, %v670_v4  ;;  %v285_v59 = vstv %s693_s12 }
  0x4e   :  { %s712_s17 = sld [smem:[#allocation11 + $0x4]]  ;;  %v286_v62 = vmul.f32 %v285_v59, %v676_v11  ;;  %v289_v8 = vstv %s696_s13  ;;  %v243_v14 = vsel %vm241_vm6, %v240_v48, %v242_v0 }
  0x4f   :  { %v265_v60 = vadd.f32 %v264_v49, %v262_v55  ;;  %v279_v61 = vadd.f32 %v278_v57, %v275_v56  ;;  %v295_v63 = vstv %s408_s2  ;;  %s319_s18 = sld [smem:[#allocation12]] }
  0x50   :  { %v296_v1 = vmul.f32 %v295_v63, %v646_v36  ;;  %v298_v2 = vstv %s409_s14  ;;  %s414_s19 = sld [smem:[#allocation12 + $0x80]] }
  0x51   :  { %v283_v5 = vadd.f32 %v282_v58, %v279_v61  ;;  %v299_v6 = vmul.f32 %v298_v2, %v657_v50  ;;  %s717_s20 = sld [smem:[#allocation12 + $0x100]]  ;;  %v267_v7 = vmul.f32 0.01, %v265_v60  ;;  %v302_v9 = vstv %s701_s15 }
  0x52   :  { %v306_v10 = vstv %s705_s0  ;;  %s416_s1 = sld [smem:[#allocation12 + $0x180]]  ;;  %vm266_vm7 = vcmp.ge.f32.partialorder %v265_v60, 0.0  ;;  %v303_v36 = vmul.f32 %v302_v9, %v662_v53 }
  0x53   :  { %v287_v12 = vadd.f32 %v286_v62, %v283_v5  ;;  %v300_v13 = vadd.f32 %v299_v6, %v296_v1  ;;  %v307_v15 = vmul.f32 %v306_v10, %v670_v4  ;;  %v310_v16 = vstv %s708_s16  ;;  %s417_s21 = sld [smem:[#allocation12 + $0x200]] }
  0x54   :  { %v311_v18 = vmul.f32 %v310_v16, %v676_v11  ;;  %v268_v20 = vsel %vm266_vm7, %v265_v60, %v267_v7  ;;  %v314_v53 = vstv %s712_s17 }
  0x55   :  { %v290_v17 = vadd.f32 %v289_v8, %v287_v12  ;;  %v304_v50 = vadd.f32 %v303_v36, %v300_v13  ;;  %v320_v19 = vstv %s319_s18 }
  0x56   :  { %v321_v21 = vmul.f32 %v320_v19, %v218_v3  ;;  %v323_v22 = vstv %s414_s19 }
  0x57   :  { %vm291_vm8 = vcmp.ge.f32.partialorder %v290_v17, 0.0  ;;  %v292_v23 = vmul.f32 0.01, %v290_v17  ;;  %v308_v24 = vadd.f32 %v307_v15, %v304_v50  ;;  %v324_v25 = vmul.f32 %v323_v22, %v243_v14 }
  0x58   :  { %v327_v26 = vstv %s717_s20  ;;  %v331_v27 = vstv %s416_s1 }
  0x59   :  { %v293_v28 = vsel %vm291_vm8, %v290_v17, %v292_v23  ;;  %v312_v29 = vadd.f32 %v311_v18, %v308_v24  ;;  %v325_v4 = vadd.f32 %v324_v25, %v321_v21  ;;  %v328_v30 = vmul.f32 %v327_v26, %v268_v20 }
  0x5a   :  { %v332_v31 = vmul.f32 %v331_v27, %v293_v28  ;;  %v335_v34 = vstv %s417_s21 }
  0x5b   :  { %v315_v32 = vadd.f32 %v314_v53, %v312_v29  ;;  %v329_v33 = vadd.f32 %v328_v30, %v325_v4 }
  0x5d   :  { %vm316_vm9 = vcmp.ge.f32.partialorder %v315_v32, 0.0  ;;  %v317_v11 = vmul.f32 0.01, %v315_v32  ;;  %v333_v35 = vadd.f32 %v332_v31, %v329_v33 }
  0x5f   :  { %v318_v37 = vsel %vm316_vm9, %v315_v32, %v317_v11 }
  0x60   :  { %v336_v38 = vmul.f32 %v335_v34, %v318_v37 }
  0x62   :  { %v337_v40 = vadd.f32 %v336_v38, %v333_v35 }
  0x64   :  { %v340_v41 = vadd.f32 %v339_v39, %v337_v40 }
  0x66   :  { %v341_v42 = vsub.f32 0.0, %v340_v41 }
  0x68   :  { %v342_v43 = vmul.f32 1.442695, %v341_v42 }
  0x6a   :  { %427 = vpow2.f32 %v342_v43 }
  0x70   :  { %v428_v44 = vpop.eup %427 }
  0x71   :  { %v344_v45 = vadd.f32 1.0, %v428_v44 }
  0x73   :  { %429 = vrcp.f32 %v344_v45 }
  0x79   :  { %v430_v46 = vpop.eup %429 }
  0x7a   :  { %346 = vst [vmem:[#allocation15] sm:$0xff] %v430_v46 }
  0x7b   :  { %357 = dma.vmem_to_hbm [thread:$0]  %s353_s4, 128, %s355_s25, [#allocation5]  }
  0x7c   :  { %549 = dma.done.wait [#allocation5], 128  }
  0x7d   :  { %550 = vsyncadd [#allocation5], 4294967168 }
  0x7e   :  { %362 = vsyncpa [#allocation4], 1 }
  0x7f   :  { %363 = vsyncpa [#allocation5], 1 }
  0x80   :  { %364 = vsyncpa [#allocation6], 1 }
  0x81   :  { %365 = vsyncpa [#allocation7], 1 }
  0x82   :  { %366 = vsyncpa [#allocation10], 1 }
  0x83   :  { %367 = vsyncpa [#allocation13], 1 }

</bundles_post_ra>
